<compile_context>
chip_gen: v7x
topology: tpu7x:2x2x1
jax: 0.10.0
libtpu: 0.0.40
codegen_flags: <defaults>
</compile_context>

<pallas_src>
import functools
import jax
import jax.numpy as jnp
from jax import lax
from jax.experimental import pallas as pl
from jax.experimental.pallas import tpu as pltpu

NUM_GROUPS = 8
EPS = 1e-5
LANE = 128
LOG2E = 1.4426950408889634


def _round_up(n, m):
    return ((n + m - 1) // m) * m


def _pick_tile(n, target):
    """Largest tile <= target that divides n and keeps sublane (8) alignment."""
    if n <= target:
        return n
    for t in range(min(target, n), 7, -1):
        if n % t == 0 and t % 8 == 0:
            return t
    return n


def _vmem_limit_bytes(working_set_bytes):
    # Generation-aware cap: derive from the chip's physical VMEM instead of a
    # fixed constant (v5e/v6e: 128 MiB, v7x: 64 MiB).
    try:
        cap = int(pltpu.get_tpu_info().vmem_capacity_bytes)
    except Exception:
        cap = 64 * 1024 * 1024
    if working_set_bytes <= 24 * 1024 * 1024:
        return None
    return min(int(working_set_bytes) + (4 << 20), int(cap * 0.85))


def _compiler_params(dim_sem, working_set_bytes):
    return pltpu.CompilerParams(dimension_semantics=dim_sem,
                                vmem_limit_bytes=_vmem_limit_bytes(working_set_bytes))


def _lane_bcast(rep, n):
    """Broadcast a lane-replicated (R, LANE) array to (R, n)."""
    if n == LANE:
        return rep
    if n % LANE == 0:
        return jnp.tile(rep, (1, n // LANE))
    return jnp.broadcast_to(rep[:, :1], (rep.shape[0], n))


# ---------------------------------------------------------------------------
# Kernel 1a: streaming GroupNorm statistics -> per-channel scale / shift
# ---------------------------------------------------------------------------
def gn_stats_kernel(x_ref, g_ref, gt_ref, gamma_ref, beta_ref,
                    scale_ref, shift_ref, s_sc, ss_sc, *, n_per_group):
    hi = pl.program_id(1)

    @pl.when(hi == 0)
    def _():
        s_sc[...] = jnp.zeros_like(s_sc)
        ss_sc[...] = jnp.zeros_like(ss_sc)

    x = x_ref[...]                                         # (thw, Cp) f32
    # Sublane reductions on the VPU/XLU (not M=1 MXU matmuls over HW).
    s_sc[...] += jnp.sum(x, axis=0, keepdims=True)
    ss_sc[...] += jnp.sum(x * x, axis=0, keepdims=True)

    @pl.when(hi == pl.num_programs(1) - 1)
    def _():
        # Tiny per-group reduce / broadcast (K=Cp or K=8, once per batch).
        gsum = jnp.dot(s_sc[...], g_ref[...], preferred_element_type=jnp.float32)
        gsumsq = jnp.dot(ss_sc[...], g_ref[...], preferred_element_type=jnp.float32)
        gmean = gsum / n_per_group
        # Biased variance (matches PyTorch GroupNorm), all stats in f32.
        gvar = gsumsq / n_per_group - gmean * gmean
        mean_c = jnp.dot(gmean, gt_ref[...], preferred_element_type=jnp.float32)
        var_c = jnp.dot(gvar, gt_ref[...], preferred_element_type=jnp.float32)
        scale_c = lax.rsqrt(var_c + EPS) * gamma_ref[...]
        scale_ref[...] = scale_c
        shift_ref[...] = beta_ref[...] - mean_c * scale_c


# ---------------------------------------------------------------------------
# Kernel 1b: normalize + SiLU + q/k/v 1x1 projections (q pre-scaled)
# ---------------------------------------------------------------------------
def norm_qkv_kernel(x_ref, scale_ref, shift_ref,
                    wq_ref, wk_ref, wv_ref, bq_ref, bk_ref, bv_ref,
                    q_ref, k_ref, v_ref):
    xn = x_ref[...] * scale_ref[...] + shift_ref[...]      # (thw, Cp) f32
    h = (xn * jax.nn.sigmoid(xn)).astype(jnp.bfloat16)     # SiLU

    # TODO(synk): pipeline_mode=pl.Buffered(1) on the weight specs would drop
    # their second pipeline buffer; omitted here for compile safety.
    q_ref[...] = (jnp.dot(h, wq_ref[...], preferred_element_type=jnp.float32)
                  + bq_ref[...]).astype(jnp.bfloat16)
    k_ref[...] = (jnp.dot(h, wk_ref[...], preferred_element_type=jnp.float32)
                  + bk_ref[...]).astype(jnp.bfloat16)
    v_ref[...] = (jnp.dot(h, wv_ref[...], preferred_element_type=jnp.float32)
                  + bv_ref[...]).astype(jnp.bfloat16)


# ---------------------------------------------------------------------------
# Kernel 2: flash attention (K/V resident per batch) + out conv + residual
# ---------------------------------------------------------------------------
def flash_attn_out_kernel(x_ref, q_ref, k_ref, v_ref, wo_ref, bo_ref, o_ref,
                          acc_sc, m_sc, l_sc, *, tk, nkv):
    cp = acc_sc.shape[-1]

    # Every grid step is a complete attention row -> unconditional init.
    m_sc[...] = jnp.full(m_sc.shape, -jnp.inf, jnp.float32)
    l_sc[...] = jnp.zeros(l_sc.shape, jnp.float32)
    acc_sc[...] = jnp.zeros(acc_sc.shape, jnp.float32)

    q = q_ref[...]                       # (tq, Cp) bf16, pre-scaled by C^-0.5*log2e

    def body(i, carry):
        start = pl.multiple_of(i * tk, tk)
        k = k_ref[pl.ds(start, tk), :]   # (tk, Cp) bf16, already in VMEM
        v = v_ref[pl.ds(start, tk), :]
        s = lax.dot_general(q, k, (((1,), (1,)), ((), ())),
                            preferred_element_type=jnp.float32)       # (tq, tk)
        m_prev = m_sc[...]                                            # (tq, LANE)
        m_next = jnp.maximum(m_prev, jnp.max(s, axis=-1, keepdims=True))
        alpha = jnp.exp2(m_prev - m_next)                             # (tq, LANE)
        p = jnp.exp2(s - _lane_bcast(m_next, tk))                     # (tq, tk)
        l_sc[...] = alpha * l_sc[...] + jnp.sum(p, axis=-1, keepdims=True)
        acc_sc[...] = _lane_bcast(alpha, cp) * acc_sc[...] + jnp.dot(
            p.astype(jnp.bfloat16), v, preferred_element_type=jnp.float32)
        m_sc[...] = m_next
        return carry

    lax.fori_loop(0, nkv, body, 0)

    # Deferred softmax normalization: one EUP reciprocal per query row.
    inv_l = pl.reciprocal(l_sc[...], approx=True)                     # (tq, LANE)
    out_un = acc_sc[...] * _lane_bcast(inv_l, cp)
    o = jnp.dot(out_un.astype(jnp.bfloat16), wo_ref[...],
                preferred_element_type=jnp.float32) + bo_ref[...]
    o_ref[...] = x_ref[...] + o


# ---------------------------------------------------------------------------
# Wrapper
# ---------------------------------------------------------------------------
def attention_block(x_nchw, params, *, q_tile=256, kv_tile=512, hw_tile=512):
    B, C, H, W = x_nchw.shape
    assert C % NUM_GROUPS == 0
    HW = H * W
    Cg = C // NUM_GROUPS
    Cp = _round_up(C, LANE)
    scale = float(C) ** (-0.5)
    n_per_group = float(HW * Cg)

    tq = _pick_tile(HW, q_tile)
    thw = _pick_tile(HW, hw_tile)
    if B == 1 and HW >= 16:
        # Keep at least two blocks on a parallel axis so both v7x TCs get work.
        if HW // tq < 2:
            tq = _pick_tile(HW, max(8, HW // 2))
        if HW // thw < 2:
            thw = _pick_tile(HW, max(8, HW // 2))
    tk = _pick_tile(HW, kv_tile)
    nq, nkv, nhw = HW // tq, HW // tk, HW // thw

    # NCHW -> (B, HW, C) -> zero-pad channels to Cp.
    # TODO(synk): fuse these layout passes (transpose+pad and the inverse on the
    # output) into the kernels to save full-tensor HBM round trips on v5e.
    x = jnp.transpose(x_nchw.reshape(B, C, HW), (0, 2, 1)).astype(jnp.float32)
    x = jnp.pad(x, ((0, 0), (0, 0), (0, Cp - C)))

    def padc(v):                            # (C,) -> (1, Cp)
        return jnp.pad(v.astype(jnp.float32), (0, Cp - C)).reshape(1, Cp)

    def padw(w):                            # (Cin, Cout) -> (Cp, Cp)
        return jnp.pad(w.astype(jnp.float32), ((0, Cp - C), (0, Cp - C)))

    # Group membership one-hot; padded channels map to no group.
    G = jax.nn.one_hot(jnp.arange(Cp) // Cg, NUM_GROUPS, dtype=jnp.float32)
    GT = G.T
    gamma, beta = padc(params["gamma"]), padc(params["beta"])

    # Fold attention scale and the exp->exp2 conversion into the q projection.
    qscale = scale * LOG2E
    wq = (padw(params["wq"].T) * qscale).astype(jnp.bfloat16)
    wk = padw(params["wk"].T).astype(jnp.bfloat16)
    wv = padw(params["wv"].T).astype(jnp.bfloat16)
    bq = padc(params["bq"]) * qscale
    bk = padc(params["bk"])
    bv = padc(params["bv"])
    woT = padw(params["wo"].T).astype(jnp.bfloat16)
    bo = padc(params["bo"])

    # ---- kernel 1a: GroupNorm statistics ------------------------------------
    ws1a = 2 * thw * Cp * 4 + 4 * NUM_GROUPS * Cp * 4 + 8 * Cp * 4 + 2 * 8 * Cp * 4
    scale_c, shift_c = pl.pallas_call(
        functools.partial(gn_stats_kernel, n_per_group=n_per_group),
        out_shape=(jax.ShapeDtypeStruct((B, 1, Cp), jnp.float32),
                   jax.ShapeDtypeStruct((B, 1, Cp), jnp.float32)),
        grid_spec=pltpu.PrefetchScalarGridSpec(
            num_scalar_prefetch=0,
            grid=(B, nhw),
            in_specs=[
                pl.BlockSpec((None, thw, Cp), lambda b, hi: (b, hi, 0)),   # x
                pl.BlockSpec((Cp, NUM_GROUPS), lambda b, hi: (0, 0)),      # G
                pl.BlockSpec((NUM_GROUPS, Cp), lambda b, hi: (0, 0)),      # G^T
                pl.BlockSpec((1, Cp), lambda b, hi: (0, 0)),               # gamma
                pl.BlockSpec((1, Cp), lambda b, hi: (0, 0)),               # beta
            ],
            out_specs=[
                pl.BlockSpec((None, 1, Cp), lambda b, hi: (b, 0, 0)),      # scale
                pl.BlockSpec((None, 1, Cp), lambda b, hi: (b, 0, 0)),      # shift
            ],
            scratch_shapes=[pltpu.VMEM((1, Cp), jnp.float32),
                            pltpu.VMEM((1, Cp), jnp.float32)],
        ),
        compiler_params=_compiler_params(("parallel", "arbitrary"), ws1a),
        cost_estimate=pl.CostEstimate(flops=int(3 * B * HW * Cp),
                                      transcendentals=0,
                                      bytes_accessed=int(B * HW * Cp * 4)),
    )(x, G, GT, gamma, beta)

    # ---- kernel 1b: normalize + SiLU + q/k/v projections ---------------------
    ws1b = 2 * (thw * Cp * 4 + 2 * Cp * 4 + 3 * Cp * Cp * 2 + 3 * Cp * 4
                + 3 * thw * Cp * 2)
    qkv_shape = jax.ShapeDtypeStruct((B, HW, Cp), jnp.bfloat16)
    q, k, v = pl.pallas_call(
        norm_qkv_kernel,
        out_shape=(qkv_shape, qkv_shape, qkv_shape),
        grid_spec=pltpu.PrefetchScalarGridSpec(
            num_scalar_prefetch=0,
            grid=(B, nhw),
            in_specs=[
                pl.BlockSpec((None, thw, Cp), lambda b, hi: (b, hi, 0)),   # x
                pl.BlockSpec((None, 1, Cp), lambda b, hi: (b, 0, 0)),      # scale
                pl.BlockSpec((None, 1, Cp), lambda b, hi: (b, 0, 0)),      # shift
                pl.BlockSpec((Cp, Cp), lambda b, hi: (0, 0)),              # wq (bf16)
                pl.BlockSpec((Cp, Cp), lambda b, hi: (0, 0)),              # wk
                pl.BlockSpec((Cp, Cp), lambda b, hi: (0, 0)),              # wv
                pl.BlockSpec((1, Cp), lambda b, hi: (0, 0)),               # bq
                pl.BlockSpec((1, Cp), lambda b, hi: (0, 0)),               # bk
                pl.BlockSpec((1, Cp), lambda b, hi: (0, 0)),               # bv
            ],
            out_specs=[
                pl.BlockSpec((None, thw, Cp), lambda b, hi: (b, hi, 0)),
                pl.BlockSpec((None, thw, Cp), lambda b, hi: (b, hi, 0)),
                pl.BlockSpec((None, thw, Cp), lambda b, hi: (b, hi, 0)),
            ],
        ),
        compiler_params=_compiler_params(("parallel", "parallel"), ws1b),
        cost_estimate=pl.CostEstimate(
            flops=int(6 * B * HW * Cp * Cp + 10 * B * HW * Cp),
            transcendentals=int(B * HW * Cp),
            bytes_accessed=int(B * HW * Cp * 4 + 3 * B * HW * Cp * 2
                               + 3 * Cp * Cp * 2)),
    )(x, scale_c, shift_c, wq, wk, wv, bq, bk, bv)

    # ---- kernel 2: flash attention (resident K/V) + out conv + residual ------
    ws2 = (2 * (tq * Cp * 4 + tq * Cp * 2 + 2 * HW * Cp * 2 + Cp * Cp * 2
                + Cp * 4 + tq * Cp * 4)
           + tq * Cp * 4 + 2 * tq * LANE * 4 + 4 * tq * tk * 4)
    out = pl.pallas_call(
        functools.partial(flash_attn_out_kernel, tk=tk, nkv=nkv),
        out_shape=jax.ShapeDtypeStruct((B, HW, Cp), jnp.float32),
        grid_spec=pltpu.PrefetchScalarGridSpec(
            num_scalar_prefetch=0,
            grid=(B, nq),
            in_specs=[
                pl.BlockSpec((None, tq, Cp), lambda b, qi: (b, qi, 0)),    # x (residual)
                pl.BlockSpec((None, tq, Cp), lambda b, qi: (b, qi, 0)),    # q tile
                pl.BlockSpec((None, HW, Cp), lambda b, qi: (b, 0, 0)),     # K resident/batch
                pl.BlockSpec((None, HW, Cp), lambda b, qi: (b, 0, 0)),     # V resident/batch
                pl.BlockSpec((Cp, Cp), lambda b, qi: (0, 0)),              # woT (bf16)
                pl.BlockSpec((1, Cp), lambda b, qi: (0, 0)),               # bo
            ],
            out_specs=pl.BlockSpec((None, tq, Cp), lambda b, qi: (b, qi, 0)),
            scratch_shapes=[
                pltpu.VMEM((tq, Cp), jnp.float32),    # f32 output accumulator
                pltpu.VMEM((tq, LANE), jnp.float32),  # running max (lane-replicated)
                pltpu.VMEM((tq, LANE), jnp.float32),  # running denom (lane-replicated)
            ],
        ),
        compiler_params=_compiler_params(("parallel", "parallel"), ws2),
        cost_estimate=pl.CostEstimate(
            flops=int(B * (4 * HW * HW * Cp + 2 * HW * Cp * Cp)),
            transcendentals=int(B * HW * HW),
            bytes_accessed=int(B * (2 * HW * Cp * 4 + 3 * HW * Cp * 2)
                               + Cp * Cp * 2)),
    )(x, q, k, v, woT, bo)

    # (B, HW, Cp) -> drop channel padding -> NCHW
    out = out[:, :, :C]
    return jnp.transpose(out, (0, 2, 1)).reshape(B, C, H, W)


# ---------------------------------------------------------------------------
# Pure-JAX reference (matches the PyTorch forward), params, test
# ---------------------------------------------------------------------------
def reference_attention_block(x, params):
    B, C, H, W = x.shape
    Cg = C // NUM_GROUPS
    scale = float(C) ** (-0.5)

    xg = x.reshape(B, NUM_GROUPS, Cg, H, W)
    mean = jnp.mean(xg, axis=(2, 3, 4), keepdims=True)
    var = jnp.var(xg, axis=(2, 3, 4), keepdims=True)
    xn = ((xg - mean) / jnp.sqrt(var + EPS)).reshape(B, C, H, W)
    xn = xn * params["gamma"].reshape(1, C, 1, 1) + params["beta"].reshape(1, C, 1, 1)
    h = xn * jax.nn.sigmoid(xn)

    def conv1x1(t, w, b):
        return jnp.einsum('oc,bchw->bohw', w, t) + b.reshape(1, -1, 1, 1)

    q = conv1x1(h, params["wq"], params["bq"]).reshape(B, C, H * W)
    k = conv1x1(h, params["wk"], params["bk"]).reshape(B, C, H * W)
    v = conv1x1(h, params["wv"], params["bv"]).reshape(B, C, H * W)

    attn = jnp.einsum('bci,bcj->bij', q, k) * scale
    attn = jax.nn.softmax(attn, axis=2)
    out = jnp.einsum('bij,bcj->bci', attn, v).reshape(B, C, H, W)
    out = conv1x1(out, params["wo"], params["bo"])
    return x + out


def make_params(key, C):
    ks = jax.random.split(key, 10)
    return {
        "gamma": 1.0 + 0.1 * jax.random.normal(ks[0], (C,), jnp.float32),
        "beta": 0.05 * jax.random.normal(ks[1], (C,), jnp.float32),
        "wq": 0.1 * jax.random.normal(ks[2], (C, C), jnp.float32),
        "bq": 0.05 * jax.random.normal(ks[3], (C,), jnp.float32),
        "wk": 0.1 * jax.random.normal(ks[4], (C, C), jnp.float32),
        "bk": 0.05 * jax.random.normal(ks[5], (C,), jnp.float32),
        "wv": 0.1 * jax.random.normal(ks[6], (C, C), jnp.float32),
        "bv": 0.05 * jax.random.normal(ks[7], (C,), jnp.float32),
        "wo": 0.1 * jax.random.normal(ks[8], (C, C), jnp.float32),
        "bo": 0.05 * jax.random.normal(ks[9], (C,), jnp.float32),
    }


if __name__ == "__main__":
    B, C, H, W = 2, 32, 16, 16   # channels divisible by 8 groups
    key = jax.random.PRNGKey(0)
    kx, kp = jax.random.split(key)
    x = jax.random.normal(kx, (B, C, H, W), jnp.float32)
    params = make_params(kp, C)

    y = jax.block_until_ready(attention_block(x, params))
    y_ref = reference_attention_block(x, params)

    assert y.shape == (B, C, H, W)
    # bf16 MXU operands with f32 accumulation -> ~1e-2-level agreement vs f32 ref
    assert jnp.allclose(y, y_ref, rtol=3e-2, atol=3e-2), \
        f"max abs diff {jnp.max(jnp.abs(y - y_ref))}"

    print("KERNEL_OK")
</pallas_src>

<mosaic_0001>
module attributes {stable_mosaic.version = 11 : i64} {
  func.func @gn_stats_kernel(%arg0: i32, %arg1: i32, %arg2: memref<1x256x128xf32, #tpu.memory_space<vmem>>, %arg3: memref<128x8xf32, #tpu.memory_space<vmem>>, %arg4: memref<8x128xf32, #tpu.memory_space<vmem>>, %arg5: memref<1x128xf32, #tpu.memory_space<vmem>>, %arg6: memref<1x128xf32, #tpu.memory_space<vmem>>, %arg7: memref<1x1x128xf32, #tpu.memory_space<vmem>>, %arg8: memref<1x1x128xf32, #tpu.memory_space<vmem>>, %arg9: memref<1x128xf32, #tpu.memory_space<vmem>>, %arg10: memref<1x128xf32, #tpu.memory_space<vmem>>) attributes {dimension_semantics = [#tpu.dimension_semantics<parallel>, #tpu.dimension_semantics<arbitrary>], iteration_bounds = array<i64: 2, 1>, scalar_prefetch = 0 : i64, scratch_operands = 2 : i64, tpu.core_type = #tpu.core_type<tc>, window_params = [{transform_indices = @transform_0, window_bounds = array<i64: 1, 256, 128>}, {pipeline_mode = #tpu.pipeline_mode<synchronous>, transform_indices = @transform_1, window_bounds = array<i64: 128, 8>}, {pipeline_mode = #tpu.pipeline_mode<synchronous>, transform_indices = @transform_2, window_bounds = array<i64: 8, 128>}, {pipeline_mode = #tpu.pipeline_mode<synchronous>, transform_indices = @transform_3, window_bounds = array<i64: 1, 128>}, {pipeline_mode = #tpu.pipeline_mode<synchronous>, transform_indices = @transform_4, window_bounds = array<i64: 1, 128>}, {transform_indices = @transform_5, window_bounds = array<i64: 1, 1, 128>}, {transform_indices = @transform_6, window_bounds = array<i64: 1, 1, 128>}]} {
    %c0_i32 = arith.constant 0 : i32
    %0 = arith.cmpi eq, %arg1, %c0_i32 : i32
    %1 = arith.extui %0 : i1 to i32
    %c0_i32_0 = arith.constant 0 : i32
    %2 = arith.cmpi ne, %1, %c0_i32_0 : i32
    scf.if %2 {
      %cst_14 = arith.constant 0.000000e+00 : f32
      %19 = vector.broadcast %cst_14 : f32 to vector<1x128xf32>
      %c0_15 = arith.constant 0 : index
      %c0_16 = arith.constant 0 : index
      %20 = vector.load %arg9[%c0_15, %c0_16] : memref<1x128xf32, #tpu.memory_space<vmem>>, vector<1x128xf32>
      tpu.vector_store %arg9[%c0_15, %c0_16], %19 {strides = array<i32>} : memref<1x128xf32, #tpu.memory_space<vmem>>, vector<1x128xf32>,
      %cst_17 = arith.constant 0.000000e+00 : f32
      %21 = vector.broadcast %cst_17 : f32 to vector<1x128xf32>
      %c0_18 = arith.constant 0 : index
      %c0_19 = arith.constant 0 : index
      %22 = vector.load %arg10[%c0_18, %c0_19] : memref<1x128xf32, #tpu.memory_space<vmem>>, vector<1x128xf32>
      tpu.vector_store %arg10[%c0_18, %c0_19], %21 {strides = array<i32>} : memref<1x128xf32, #tpu.memory_space<vmem>>, vector<1x128xf32>,
    } else {
    }
    %c0 = arith.constant 0 : index
    %c0_1 = arith.constant 0 : index
    %c0_2 = arith.constant 0 : index
    %3 = vector.load %arg2[%c0, %c0_1, %c0_2] : memref<1x256x128xf32, #tpu.memory_space<vmem>>, vector<1x256x128xf32>
    %4 = vector.shape_cast %3 : vector<1x256x128xf32> to vector<256x128xf32>
    %c0_3 = arith.constant 0 : index
    %c0_4 = arith.constant 0 : index
    %5 = vector.load %arg9[%c0_3, %c0_4] : memref<1x128xf32, #tpu.memory_space<vmem>>, vector<1x128xf32>
    %cst = arith.constant dense<0.000000e+00> : vector<128xf32>
    %6 = vector.multi_reduction <add>, %4, %cst [0] : vector<256x128xf32> to vector<128xf32>
    %7 = vector.shape_cast %6 : vector<128xf32> to vector<1x128xf32>
    %8 = arith.addf %5, %7 : vector<1x128xf32>
    %c0_5 = arith.constant 0 : index
    %c0_6 = arith.constant 0 : index
    %9 = vector.load %arg9[%c0_5, %c0_6] : memref<1x128xf32, #tpu.memory_space<vmem>>, vector<1x128xf32>
    tpu.vector_store %arg9[%c0_5, %c0_6], %8 {strides = array<i32>} : memref<1x128xf32, #tpu.memory_space<vmem>>, vector<1x128xf32>,
    %c0_7 = arith.constant 0 : index
    %c0_8 = arith.constant 0 : index
    %10 = vector.load %arg10[%c0_7, %c0_8] : memref<1x128xf32, #tpu.memory_space<vmem>>, vector<1x128xf32>
    %11 = arith.mulf %4, %4 : vector<256x128xf32>
    %cst_9 = arith.constant dense<0.000000e+00> : vector<128xf32>
    %12 = vector.multi_reduction <add>, %11, %cst_9 [0] : vector<256x128xf32> to vector<128xf32>
    %13 = vector.shape_cast %12 : vector<128xf32> to vector<1x128xf32>
    %14 = arith.addf %10, %13 : vector<1x128xf32>
    %c0_10 = arith.constant 0 : index
    %c0_11 = arith.constant 0 : index
    %15 = vector.load %arg10[%c0_10, %c0_11] : memref<1x128xf32, #tpu.memory_space<vmem>>, vector<1x128xf32>
    tpu.vector_store %arg10[%c0_10, %c0_11], %14 {strides = array<i32>} : memref<1x128xf32, #tpu.memory_space<vmem>>, vector<1x128xf32>,
    %c0_i32_12 = arith.constant 0 : i32
    %16 = arith.cmpi eq, %arg1, %c0_i32_12 : i32
    %17 = arith.extui %16 : i1 to i32
    %c0_i32_13 = arith.constant 0 : i32
    %18 = arith.cmpi ne, %17, %c0_i32_13 : i32
    scf.if %18 {
      %c0_14 = arith.constant 0 : index
      %c0_15 = arith.constant 0 : index
      %19 = vector.load %arg9[%c0_14, %c0_15] : memref<1x128xf32, #tpu.memory_space<vmem>>, vector<1x128xf32>
      %c0_16 = arith.constant 0 : index
      %c0_17 = arith.constant 0 : index
      %20 = vector.load %arg3[%c0_16, %c0_17] : memref<128x8xf32, #tpu.memory_space<vmem>>, vector<128x8xf32>
      %cst_18 = arith.constant dense<0.000000e+00> : vector<1x8xf32>
      %21 = tpu.matmul %19, %20, %cst_18 {dimension_numbers = #tpu.dot_dimension_numbers<[1], [0], [0], [1], [0, 0, 1, 1], [], []>} : vector<1x128xf32>, vector<128x8xf32>, vector<1x8xf32> -> vector<1x8xf32>
      %c0_19 = arith.constant 0 : index
      %c0_20 = arith.constant 0 : index
      %22 = vector.load %arg10[%c0_19, %c0_20] : memref<1x128xf32, #tpu.memory_space<vmem>>, vector<1x128xf32>
      %c0_21 = arith.constant 0 : index
      %c0_22 = arith.constant 0 : index
      %23 = vector.load %arg3[%c0_21, %c0_22] : memref<128x8xf32, #tpu.memory_space<vmem>>, vector<128x8xf32>
      %cst_23 = arith.constant dense<0.000000e+00> : vector<1x8xf32>
      %24 = tpu.matmul %22, %23, %cst_23 {dimension_numbers = #tpu.dot_dimension_numbers<[1], [0], [0], [1], [0, 0, 1, 1], [], []>} : vector<1x128xf32>, vector<128x8xf32>, vector<1x8xf32> -> vector<1x8xf32>
      %cst_24 = arith.constant 1.024000e+03 : f32
      %25 = vector.broadcast %cst_24 : f32 to vector<1x8xf32>
      %26 = arith.divf %21, %25 : vector<1x8xf32>
      %cst_25 = arith.constant 1.024000e+03 : f32
      %27 = vector.broadcast %cst_25 : f32 to vector<1x8xf32>
      %28 = arith.divf %24, %27 : vector<1x8xf32>
      %29 = arith.mulf %26, %26 : vector<1x8xf32>
      %30 = arith.subf %28, %29 : vector<1x8xf32>
      %c0_26 = arith.constant 0 : index
      %c0_27 = arith.constant 0 : index
      %31 = vector.load %arg4[%c0_26, %c0_27] : memref<8x128xf32, #tpu.memory_space<vmem>>, vector<8x128xf32>
      %cst_28 = arith.constant dense<0.000000e+00> : vector<1x128xf32>
      %32 = tpu.matmul %26, %31, %cst_28 {dimension_numbers = #tpu.dot_dimension_numbers<[1], [0], [0], [1], [0, 0, 1, 1], [], []>} : vector<1x8xf32>, vector<8x128xf32>, vector<1x128xf32> -> vector<1x128xf32>
      %c0_29 = arith.constant 0 : index
      %c0_30 = arith.constant 0 : index
      %33 = vector.load %arg4[%c0_29, %c0_30] : memref<8x128xf32, #tpu.memory_space<vmem>>, vector<8x128xf32>
      %cst_31 = arith.constant dense<0.000000e+00> : vector<1x128xf32>
      %34 = tpu.matmul %30, %33, %cst_31 {dimension_numbers = #tpu.dot_dimension_numbers<[1], [0], [0], [1], [0, 0, 1, 1], [], []>} : vector<1x8xf32>, vector<8x128xf32>, vector<1x128xf32> -> vector<1x128xf32>
      %cst_32 = arith.constant 9.99999974E-6 : f32
      %35 = vector.broadcast %cst_32 : f32 to vector<1x128xf32>
      %36 = arith.addf %34, %35 : vector<1x128xf32>
      %37 = math.rsqrt %36 : vector<1x128xf32>
      %c0_33 = arith.constant 0 : index
      %c0_34 = arith.constant 0 : index
      %38 = vector.load %arg5[%c0_33, %c0_34] : memref<1x128xf32, #tpu.memory_space<vmem>>, vector<1x128xf32>
      %39 = arith.mulf %37, %38 : vector<1x128xf32>
      %c0_35 = arith.constant 0 : index
      %c0_36 = arith.constant 0 : index
      %c0_37 = arith.constant 0 : index
      %40 = vector.load %arg7[%c0_35, %c0_36, %c0_37] : memref<1x1x128xf32, #tpu.memory_space<vmem>>, vector<1x1x128xf32>
      %41 = vector.shape_cast %40 : vector<1x1x128xf32> to vector<1x128xf32>
      %42 = vector.shape_cast %39 : vector<1x128xf32> to vector<1x1x128xf32>
      tpu.vector_store %arg7[%c0_35, %c0_36, %c0_37], %42 {strides = array<i32>} : memref<1x1x128xf32, #tpu.memory_space<vmem>>, vector<1x1x128xf32>,
      %c0_38 = arith.constant 0 : index
      %c0_39 = arith.constant 0 : index
      %43 = vector.load %arg6[%c0_38, %c0_39] : memref<1x128xf32, #tpu.memory_space<vmem>>, vector<1x128xf32>
      %44 = arith.mulf %32, %39 : vector<1x128xf32>
      %45 = arith.subf %43, %44 : vector<1x128xf32>
      %c0_40 = arith.constant 0 : index
      %c0_41 = arith.constant 0 : index
      %c0_42 = arith.constant 0 : index
      %46 = vector.load %arg8[%c0_40, %c0_41, %c0_42] : memref<1x1x128xf32, #tpu.memory_space<vmem>>, vector<1x1x128xf32>
      %47 = vector.shape_cast %46 : vector<1x1x128xf32> to vector<1x128xf32>
      %48 = vector.shape_cast %45 : vector<1x128xf32> to vector<1x1x128xf32>
      tpu.vector_store %arg8[%c0_40, %c0_41, %c0_42], %48 {strides = array<i32>} : memref<1x1x128xf32, #tpu.memory_space<vmem>>, vector<1x1x128xf32>,
    } else {
    }
    return
  }
  func.func @transform_0(%arg0: i32, %arg1: i32) -> (i32, i32, i32) {
    %c0_i32 = arith.constant 0 : i32
    %c0_i32_0 = arith.constant 0 : i32
    return %arg0, %arg1, %c0_i32 : i32, i32, i32
  }
  func.func @transform_1(%arg0: i32, %arg1: i32) -> (i32, i32) {
    %c0_i32 = arith.constant 0 : i32
    %c0_i32_0 = arith.constant 0 : i32
    %c0_i32_1 = arith.constant 0 : i32
    return %c0_i32, %c0_i32_0 : i32, i32
  }
  func.func @transform_2(%arg0: i32, %arg1: i32) -> (i32, i32) {
    %c0_i32 = arith.constant 0 : i32
    %c0_i32_0 = arith.constant 0 : i32
    %c0_i32_1 = arith.constant 0 : i32
    return %c0_i32, %c0_i32_0 : i32, i32
  }
  func.func @transform_3(%arg0: i32, %arg1: i32) -> (i32, i32) {
    %c0_i32 = arith.constant 0 : i32
    %c0_i32_0 = arith.constant 0 : i32
    %c0_i32_1 = arith.constant 0 : i32
    return %c0_i32, %c0_i32_0 : i32, i32
  }
  func.func @transform_4(%arg0: i32, %arg1: i32) -> (i32, i32) {
    %c0_i32 = arith.constant 0 : i32
    %c0_i32_0 = arith.constant 0 : i32
    %c0_i32_1 = arith.constant 0 : i32
    return %c0_i32, %c0_i32_0 : i32, i32
  }
  func.func @transform_5(%arg0: i32, %arg1: i32) -> (i32, i32, i32) {
    %c0_i32 = arith.constant 0 : i32
    %c0_i32_0 = arith.constant 0 : i32
    %c0_i32_1 = arith.constant 0 : i32
    return %arg0, %c0_i32, %c0_i32_0 : i32, i32, i32
  }
  func.func @transform_6(%arg0: i32, %arg1: i32) -> (i32, i32, i32) {
    %c0_i32 = arith.constant 0 : i32
    %c0_i32_0 = arith.constant 0 : i32
    %c0_i32_1 = arith.constant 0 : i32
    return %arg0, %c0_i32, %c0_i32_0 : i32, i32, i32
  }
}

</mosaic_0001>

<bundles_post_ra>
// kernel: tpu_custom_call.1
= control target key start
LH: loop header
LB: loop body
LE: loop exit
PB: predicated region body
PF: predicated region fallthrough
CT: control target
= control target key end

     0   :  { %12 = vsyncpa [#allocation5], 0  ;;  %s1682_s0 = inlined_call_operand.hbm [shape: f32[2,256,128], index: 0, kind: input, shape index: {}]   ;;  %s1683_s1 = inlined_call_operand.vmem [shape: f32[128,8], index: 1, kind: input, shape index: {}]   ;;  %s1684_s2 = inlined_call_operand.vmem [shape: f32[8,128], index: 2, kind: input, shape index: {}]   ;;  %s1685_s3 = inlined_call_operand.vmem [shape: f32[1,128], index: 3, kind: input, shape index: {}]   ;;  %s1686_s4 = inlined_call_operand.vmem [shape: f32[1,128], index: 4, kind: input, shape index: {}]   ;;  %s1687_s5 = inlined_call_operand.hbm [shape: f32[2,1,128], index: 5, kind: output, shape index: {0}]   ;;  %s1688_s6 = inlined_call_operand.hbm [shape: f32[2,1,128], index: 6, kind: output, shape index: {1}]  }
   0x1   :  { %14 = vsyncpa [#allocation5 + $0x1], 0 }
   0x2   :  { %15 = vsyncpa [#allocation6], 0 }
   0x3   :  { %17 = vsyncpa [#allocation6 + $0x1], 0 }
   0x4   :  { %18 = vsyncpa [#allocation9], 0 }
   0x5   :  { %20 = vsyncpa [#allocation9 + $0x1], 0  ;;  %s1348_s21 = smov 0   ;;  %s1350_s22 = smov 0  }
   0x6   :  { %s1352_s23 = smov 0   ;;  %s1354_s24 = smov 0  }
   0x7   :  { %s1356_s25 = smov 0   ;;  %s1358_s26 = smov 0  }
   0x8 LB: > { %s903_s27 = sadd.s32 4294967295, %s1303_s26   ;;  %s904_s28 = sadd.s32 4294967294, %s1303_s26   ;;  %s1303_s26 = sphi %s1358_s26, %s26_s26   ;;  %s1299_s25 = sphi %s1356_s25, %s1705_s25   ;;  %s1295_s24 = sphi %s1354_s24, %s1704_s24   ;;  %s1291_s23 = sphi %s1352_s23, %s1703_s23   ;;  %s1287_s22 = sphi %s1350_s22, %s1702_s22   ;;  %s1283_s21 = sphi %s1348_s21, %s1701_s21  }
   0x9   : > { %s38_s29 = sadd.s32 1, %s1299_s25  ;;  %s47_s30 = sadd.s32 1, %s1291_s23 }
   0xa   : > { %p40_p0 = scmp.ge.s32.totalorder %s38_s29, 2  ;;  %p54_p1 = scmp.ne.s32.totalorder %s1291_s23, %s1287_s22 }
   0xb   : > { %p55_p2 = scmp.eq.s32.totalorder %s1303_s26, 0  ;;  %p60_p3 = scmp.ne.s32.totalorder %s1287_s22, %s1283_s21 }
   0xc   : > { %s1707_s29 = smov (%p40_p0, %s38_s29), 0  ;;  %p61_p5 = scmp.eq.s32.totalorder %s903_s27, 0 }
   0xd   : > { %p1389_p4 = por %p55_p2, %p54_p1  ;;  %s42_s8 = ssub.s32 %s1299_s25, %s1707_s29 }
   0xe   : > { %p168_p6 = scmp.eq.s32.totalorder %s903_s27, 1  ;;  %p45_p7 = scmp.eq.s32.totalorder %s42_s8, 0 }
   0xf   : > { %p1395_p8 = por %p61_p5, %p60_p3  ;;  %p174_p10 = scmp.eq.s32.totalorder %s904_s28, 1 }
  0x10   : > { %p1399_p9 = por %p168_p6, %p54_p1  ;;  %p1102_p13 = scmp.lt.s32.totalorder %s1303_s26, 2 }
  0x11   : > { %s1404_s11 = scalar_select %p45_p7, %s1291_s23, %s47_s30  }
  0x12   : > { %s1693_s10 = scalar_select %p1399_p9, 1, 0 }
  0x13   : > { %p1406_p11 = por %p174_p10, %p60_p3  ;;  %s232_s13 = sand.u32 1, %s1291_s23  }
  0x14   : > { %s907_s14 = sshll.u32 %s232_s13, 8  ;;  %s918_s15 = sshll.u32 %s1299_s25, 12 }
  0x15   : > { %s1694_s12 = scalar_select %p1406_p11, 1, 0 }
  0x16   : > { %s1417_s18 = scalar_lea.hbm %s1682_s0, %s918_s15  ;;  %s236_s19 = scalar_lea.vmem [#allocation4], %s907_s14 }
  0x17   : > { %s245_s20 = sshll.u32 %s236_s19, 4  ;;  %p1423_p0 = pnand %p1102_p13, %p1389_p4  ;;  %s1419_s20 = int_to_ptr.vmem [resolvable:$true] %s245_s20 }
  0x18   : > { %s1428_s28 = scalar_lea.sflag [#allocation5], %s232_s13  ;;  %s1159_s30 = scalar_lea.hbm %s1417_s18, 4096 }
  0x19   : > { %p1160_p2 = scmp.ne.s32.totalorder %s1417_s18, %s1159_s30  ;;  %p1161_p3 = pneg %p1423_p0 }
  0x1a   : > { %s1164_s7 = scalar_lea.hbm %s1682_s0, 8192  ;;  %p1165_p4 = scmp.lt.u32.totalorder %s1417_s18, %s1682_s0 }
  0x1b   : > { %p1162_p5 = pnand %p1161_p3, %p1160_p2  ;;  %p1166_p7 = scmp.lt.u32.totalorder %s1164_s7, %s1159_s30 }
  0x1c   : > { %p1168_p13 = scmp.lt.u32.totalorder %s1159_s30, %s1417_s18 }
  0x1d   : > { %p1163_p6 = pneg %p1162_p5  ;;  %p1167_p10 = por %p1166_p7, %p1165_p4 }
  0x1f   : > { %p1169_p12 = por %p1168_p13, %p1167_p10 }
  0x21   : > { %p1170_p1 = pnand %p1169_p12, %p1163_p6 }
  0x23   : > { %1173 = shalt.err (!%p1170_p1)
}
  0x24   : > { %s1174_s13 = scalar_lea.vmem %s1419_s20, 4096  ;;  %s1305_s17 = smov [#allocation4]  }
  0x25   : > { %p1175_p2 = scmp.ne.s32.totalorder %s1419_s20, %s1174_s13  ;;  %s1179_s19 = sshll.u32 %s1305_s17, 4  ;;  %s1180_s19 = int_to_ptr.vmem [resolvable:$false] %s1179_s19 }
  0x26   : > { %s1181_s8 = scalar_lea.vmem %s1180_s19, 8192  ;;  %p1182_p9 = scmp.lt.s32.totalorder %s1419_s20, %s1180_s19 }
  0x27   : > { %p1177_p5 = pnand %p1175_p2, %p1161_p3  ;;  %p1183_p4 = scmp.lt.s32.totalorder %s1181_s8, %s1174_s13 }
  0x29   : > { %p1178_p11 = pneg %p1177_p5  ;;  %p1184_p7 = por %p1183_p4, %p1182_p9 }
  0x2b   : > { %p1185_p10 = pnand %p1184_p7, %p1178_p11 }
  0x2d   : > { %1188 = shalt.err (!%p1185_p10)
}
  0x2e   : > { %s1306_s30 = smov 128   ;;  %s1307_s14 = smov 8  }
  0x2f   : > { %1094 = dma.hbm_to_vmem [thread:$0]  (!%p1423_p0), %s1417_s18, 4096, %s1419_s20, %s1428_s28, %s1306_s30, %s1306_s30, %s1307_s14  }
  0x30   : > { %p253_p12 = scmp.lt.s32.totalorder %s1303_s26, 3  ;;  %p1696_p1 = scmp.ge.s32.totalorder %s1303_s26, 1 }
  0x32   : > { %p254_p3 = pnand %p1696_p1, %p253_p12 }
  0x33   : > { %s1460_s7 = sand.u32 (!%p254_p3), 1, %s1287_s22  }
  0x34   : > { %257 = sbr.rel (%p254_p3) target bundleno = 635 (0x27b), region = 40  ;;  %s911_s15 = sshll.u32 (!%p254_p3), %s1460_s7, 8 }
  0x35   : > { %s260_s16 = scalar_lea.sflag (!%p254_p3), [#allocation5], %s1460_s7  ;;  %s1464_s13 = scalar_lea.vmem (!%p254_p3), [#allocation4], %s911_s15 }
  0x3b   : > { %1270 = dma.done.wait (%p1395_p8), %s260_s16, 4096  }
  0x3c   : > { %1272 = vsyncadd (%p1395_p8), %s260_s16, 4294963200  ;;  %v1308_v0 = vmov 0.0|0.0   ;;  %v1309_v1 = vmov 0.0   ;;  %vm1310_vm0 = vmmov 0   ;;  %v450_v2 = vld [vmem:[%s1683_s1] sm:$0xff]  ;;  %v451_v3 = vld [vmem:[%s1683_s1 + $0x8] sm:$0xff] }
  0x3d   : > { %1037 = vmatprep.subr.bf16.mxu0 %v1308_v0  ;;  %1061 = vmatprep.subr.bf16.mxu1 %v1308_v0  ;;  %300 = vst [vmem:[#allocation2] sm:$0x1] %v1309_v1  ;;  %301 = vst [vmem:[#allocation3] sm:$0x1] %v1309_v1  ;;  %v452_v4 = vld [vmem:[%s1683_s1 + $0x10] sm:$0xff]  ;;  %v1038_v5 = vpack.c.bf16 %v451_v3, %v450_v2  ;;  %v453_v6 = vld [vmem:[%s1683_s1 + $0x18] sm:$0xff] }
  0x3e   : > { %989 = vmatprep.mubr.msk.f32.mxu0 %vm1310_vm0, %v1309_v1  ;;  %1024 = vmatprep.mubr.msk.f32.mxu1 %vm1310_vm0, %v1309_v1  ;;  %v1041_v7 = vpack.c.bf16 %v453_v6, %v452_v4  ;;  %v454_v8 = vld [vmem:[%s1683_s1 + $0x20] sm:$0xff]  ;;  %v455_v9 = vld [vmem:[%s1683_s1 + $0x28] sm:$0xff]  ;;  %v304_v12 = vld [vmem:[%s1464_s13 + $0x10] sm:$0xff]  ;;  %vm613_vm1 = vcmask 64512   ;;  %s914_s16 = sshll.u32 %s1295_s24, 4  ;;  %s288_s9 = scalar_lea.vmem [#allocation7], %s1460_s7 }
  0x3f   : > { %1039 = vmatpush3.bf16.msra.mxu0 %v1038_v5  ;;  %1063 = vmatpush3.bf16.msra.mxu1 %v1038_v5  ;;  %v302_v10 = vld [vmem:[%s1464_s13] sm:$0xff]  ;;  %v303_v11 = vld [vmem:[%s1464_s13 + $0x8] sm:$0xff]  ;;  %v1044_v14 = vpack.c.bf16 %v455_v9, %v454_v8  ;;  %v305_v15 = vld [vmem:[%s1464_s13 + $0x18] sm:$0xff]  ;;  %v377_v32 = vmul.f32 %v304_v12, %v304_v12  ;;  %s785_s18 = sshll.u32 %s288_s9, 4  ;;  %s1591_s28 = scalar_lea.hbm %s1687_s5, %s914_s16  ;;  %s1593_s18 = int_to_ptr.vmem [resolvable:$true] %s785_s18 }
  0x40   : > { %1040 = vmatprep.subr.bf16.mxu0 %v1308_v0  ;;  %1064 = vmatprep.subr.bf16.mxu1 %v1308_v0  ;;  %v335_v13 = vadd.f32 %v303_v11, %v302_v10  ;;  %v456_v16 = vld [vmem:[%s1683_s1 + $0x30] sm:$0xff]  ;;  %v457_v17 = vld [vmem:[%s1683_s1 + $0x38] sm:$0xff]  ;;  %v306_v19 = vld [vmem:[%s1464_s13 + $0x20] sm:$0xff]  ;;  %v375_v27 = vmul.f32 %v302_v10, %v302_v10  ;;  %v376_v28 = vmul.f32 %v303_v11, %v303_v11  ;;  %s1690_s8 = scalar_lea.vmem [#allocation8], %s1460_s7  ;;  %s769_s30 = scalar_lea.sflag [#allocation6], %s1460_s7 }
  0x41   : > { %v1047_v21 = vpack.c.bf16 %v457_v17, %v456_v16  ;;  %v307_v22 = vld [vmem:[%s1464_s13 + $0x28] sm:$0xff]  ;;  %v458_v23 = vld [vmem:[%s1683_s1 + $0x40] sm:$0xff]  ;;  %v308_v26 = vld [vmem:[%s1464_s13 + $0x30] sm:$0xff]  ;;  %v378_v37 = vmul.f32 %v305_v15, %v305_v15  ;;  %v379_v42 = vmul.f32 %v306_v19, %v306_v19  ;;  %s1189_s14 = scalar_lea.vmem %s1593_s18, 16  ;;  %p1697_p9 = scmp.ne.s32.totalorder %s1693_s10, 0 }
  0x42   : > { %v336_v18 = vadd.f32 %v335_v13, %v304_v12  ;;  %v459_v24 = vld [vmem:[%s1683_s1 + $0x48] sm:$0xff]  ;;  %v309_v31 = vld [vmem:[%s1464_s13 + $0x38] sm:$0xff]  ;;  %v460_v33 = vld [vmem:[%s1683_s1 + $0x50] sm:$0xff]  ;;  %v407_v38 = vadd.f32 %v376_v28, %v375_v27  ;;  %v380_v48 = vmul.f32 %v307_v22, %v307_v22  ;;  %v381_v53 = vmul.f32 %v308_v26, %v308_v26  ;;  %p1190_p8 = scmp.ne.s32.totalorder %s1593_s18, %s1189_s14  ;;  %s1311_s15 = smov [#allocation7]  }
  0x43   : > { %1042 = vmatpush3.bf16.msra.mxu0 %v1041_v7  ;;  %1066 = vmatpush3.bf16.msra.mxu1 %v1041_v7  ;;  %v1050_v30 = vpack.c.bf16 %v459_v24, %v458_v23  ;;  %v461_v34 = vld [vmem:[%s1683_s1 + $0x58] sm:$0xff]  ;;  %v310_v36 = vld [vmem:[%s1464_s13 + $0x40] sm:$0xff]  ;;  %v311_v41 = vld [vmem:[%s1464_s13 + $0x48] sm:$0xff]  ;;  %v382_v59 = vmul.f32 %v309_v31, %v309_v31  ;;  %s1193_s20 = sshll.u32 %s1311_s15, 4  ;;  %s1194_s20 = int_to_ptr.vmem [resolvable:$false] %s1193_s20 }
  0x44   : > { %1043 = vmatprep.subr.bf16.mxu0 %v1308_v0  ;;  %1067 = vmatprep.subr.bf16.mxu1 %v1308_v0  ;;  %v337_v20 = vadd.f32 %v336_v18, %v305_v15  ;;  %v1053_v40 = vpack.c.bf16 %v461_v34, %v460_v33  ;;  %v408_v43 = vadd.f32 %v407_v38, %v377_v32  ;;  %v462_v44 = vld [vmem:[%s1683_s1 + $0x60] sm:$0xff]  ;;  %v463_v45 = vld [vmem:[%s1683_s1 + $0x68] sm:$0xff]  ;;  %v312_v47 = vld [vmem:[%s1464_s13 + $0x50] sm:$0xff]  ;;  %p1191_p11 = pnand %p1190_p8, %p1697_p9  ;;  %s1195_s27 = scalar_lea.vmem %s1194_s20, 32 }
  0x45   : > { %v1056_v51 = vpack.c.bf16 %v463_v45, %v462_v44  ;;  %v313_v52 = vld [vmem:[%s1464_s13 + $0x58] sm:$0xff]  ;;  %v464_v55 = vld [vmem:[%s1683_s1 + $0x70] sm:$0xff]  ;;  %v314_v58 = vld [vmem:[%s1464_s13 + $0x60] sm:$0xff]  ;;  %v383_v2 = vmul.f32 %v310_v36, %v310_v36  ;;  %v384_v6 = vmul.f32 %v311_v41, %v311_v41  ;;  %v385_v10 = vmul.f32 %v312_v47, %v312_v47  ;;  %p1196_p6 = scmp.lt.s32.totalorder %s1593_s18, %s1194_s20  ;;  %p1197_p13 = scmp.lt.s32.totalorder %s1195_s27, %s1189_s14 }
  0x46   : > { %v338_v25 = vadd.f32 %v337_v20, %v306_v19  ;;  %v409_v49 = vadd.f32 %v408_v43, %v378_v37  ;;  %v465_v56 = vld [vmem:[%s1683_s1 + $0x78] sm:$0xff]  ;;  %v315_v63 = vld [vmem:[%s1464_s13 + $0x68] sm:$0xff]  ;;  %v318_v13 = vld [vmem:[%s1464_s13 + $0x80] sm:$0xff]  ;;  %v387_v17 = vmul.f32 %v314_v58, %v314_v58  ;;  %p1192_p0 = pneg %p1191_p11 }
  0x47   : > { %1045 = vmatpush3.bf16.msra.mxu0 %v1044_v14  ;;  %1069 = vmatpush3.bf16.msra.mxu1 %v1044_v14  ;;  %v1059_v62 = vpack.c.bf16 %v465_v56, %v464_v55  ;;  %v316_v5 = vld [vmem:[%s1464_s13 + $0x70] sm:$0xff]  ;;  %v317_v9 = vld [vmem:[%s1464_s13 + $0x78] sm:$0xff]  ;;  %v319_v16 = vld [vmem:[%s1464_s13 + $0x88] sm:$0xff]  ;;  %v391_v33 = vmul.f32 %v318_v13, %v318_v13  ;;  %p1198_p2 = por %p1197_p13, %p1196_p6 }
  0x48   : > { %1046 = vmatprep.subr.bf16.mxu0 %v1308_v0  ;;  %1070 = vmatprep.subr.bf16.mxu1 %v1308_v0  ;;  %v339_v29 = vadd.f32 %v338_v25, %v307_v22  ;;  %v410_v54 = vadd.f32 %v409_v49, %v379_v42  ;;  %v320_v20 = vld [vmem:[%s1464_s13 + $0x90] sm:$0xff]  ;;  %v321_v24 = vld [vmem:[%s1464_s13 + $0x98] sm:$0xff]  ;;  %v389_v25 = vmul.f32 %v316_v5, %v316_v5  ;;  %v322_v28 = vld [vmem:[%s1464_s13 + $0xa0] sm:$0xff] }
  0x49   : > { %v323_v32 = vld [vmem:[%s1464_s13 + $0xa8] sm:$0xff]  ;;  %v392_v37 = vmul.f32 %v319_v16, %v319_v16  ;;  %v326_v44 = vld [vmem:[%s1464_s13 + $0xc0] sm:$0xff]  ;;  %v394_v45 = vmul.f32 %v321_v24, %v321_v24  ;;  %v395_v49 = vmul.f32 %v322_v28, %v322_v28  ;;  %v329_v56 = vld [vmem:[%s1464_s13 + $0xd8] sm:$0xff]  ;;  %p1199_p5 = pnand %p1198_p2, %p1192_p0 }
  0x4a   : > { %v340_v35 = vadd.f32 %v339_v29, %v308_v26  ;;  %v411_v60 = vadd.f32 %v410_v54, %v380_v48  ;;  %v390_v29 = vmul.f32 %v317_v9, %v317_v9  ;;  %v327_v48 = vld [vmem:[%s1464_s13 + $0xc8] sm:$0xff] }
  0x4b   : > { %1048 = vmatpush3.bf16.msra.mxu0 %v1047_v21  ;;  %1072 = vmatpush3.bf16.msra.mxu1 %v1047_v21  ;;  %v388_v21 = vmul.f32 %v315_v63, %v315_v63 }
  0x4c   : > { %1049 = vmatprep.subr.bf16.mxu0 %v1308_v0  ;;  %1073 = vmatprep.subr.bf16.mxu1 %v1308_v0  ;;  %v341_v39 = vadd.f32 %v340_v35, %v309_v31  ;;  %v412_v3 = vadd.f32 %v411_v60, %v381_v53  ;;  %v396_v53 = vmul.f32 %v323_v32, %v323_v32  ;;  %v330_v60 = vld [vmem:[%s1464_s13 + $0xe0] sm:$0xff] }
  0x4e   : > { %v342_v46 = vadd.f32 %v341_v39, %v310_v36  ;;  %v413_v7 = vadd.f32 %v412_v3, %v382_v59  ;;  %v324_v36 = vld [vmem:[%s1464_s13 + $0xb0] sm:$0xff]  ;;  %v399_v3 = vmul.f32 %v326_v44, %v326_v44 }
  0x4f   : > { %1051 = vmatpush3.bf16.msra.mxu0 %v1050_v30  ;;  %1075 = vmatpush3.bf16.msra.mxu1 %v1050_v30 }
  0x50   : > { %1052 = vmatprep.subr.bf16.mxu0 %v1308_v0  ;;  %1076 = vmatprep.subr.bf16.mxu1 %v1308_v0  ;;  %v343_v50 = vadd.f32 %v342_v46, %v311_v41  ;;  %v414_v11 = vadd.f32 %v413_v7, %v383_v2  ;;  %v393_v41 = vmul.f32 %v320_v20, %v320_v20  ;;  %v331_v2 = vld [vmem:[%s1464_s13 + $0xe8] sm:$0xff] }
  0x51   : > { %v400_v7 = vmul.f32 %v327_v48, %v327_v48 }
  0x52   : > { %v344_v57 = vadd.f32 %v343_v50, %v312_v47  ;;  %v415_v14 = vadd.f32 %v414_v11, %v384_v6  ;;  %v332_v6 = vld [vmem:[%s1464_s13 + $0xf0] sm:$0xff] }
  0x53   : > { %1054 = vmatpush3.bf16.msra.mxu0 %v1053_v40  ;;  %1078 = vmatpush3.bf16.msra.mxu1 %v1053_v40  ;;  %v325_v40 = vld [vmem:[%s1464_s13 + $0xb8] sm:$0xff] }
  0x54   : > { %1055 = vmatprep.subr.bf16.mxu0 %v1308_v0  ;;  %1079 = vmatprep.subr.bf16.mxu1 %v1308_v0  ;;  %v345_v61 = vadd.f32 %v344_v57, %v313_v52  ;;  %v416_v18 = vadd.f32 %v415_v14, %v385_v10  ;;  %v397_v57 = vmul.f32 %v324_v36, %v324_v36  ;;  %v333_v10 = vld [vmem:[%s1464_s13 + $0xf8] sm:$0xff] }
  0x56   : > { %v346_v4 = vadd.f32 %v345_v61, %v314_v58  ;;  %v398_v61 = vmul.f32 %v325_v40, %v325_v40 }
  0x57   : > { %1057 = vmatpush3.bf16.msra.mxu0 %v1056_v51  ;;  %1081 = vmatpush3.bf16.msra.mxu1 %v1056_v51 }
  0x58   : > { %1058 = vmatprep.subr.bf16.mxu0 %v1308_v0  ;;  %1082 = vmatprep.subr.bf16.mxu1 %v1308_v0  ;;  %v347_v8 = vadd.f32 %v346_v4, %v315_v63  ;;  %v386_v0 = vmul.f32 %v313_v52, %v313_v52  ;;  %v328_v52 = vld [vmem:[%s1464_s13 + $0xd0] sm:$0xff]  ;;  %s1601_s13 = sshll.u32 %s1690_s8, 4  ;;  %s1633_s13 = int_to_ptr.vmem [resolvable:$true] %s1601_s13 }
  0x59   : > { %v401_v11 = vmul.f32 %v328_v52, %v328_v52 }
  0x5a   : > { %v348_v12 = vadd.f32 %v347_v8, %v316_v5  ;;  %v417_v22 = vadd.f32 %v416_v18, %v386_v0  ;;  %v402_v0 = vmul.f32 %v329_v56, %v329_v56 }
  0x5b   : > { %1060 = vmatpush3.bf16.msra.mxu0 %v1059_v62  ;;  %1084 = vmatpush3.bf16.msra.mxu1 %v1059_v62 }
  0x5c   : > { %1027 = vmatprep.subr.mxu0 %v1309_v1  ;;  %1032 = vmatprep.subr.mxu1 %v1309_v1  ;;  %v349_v15 = vadd.f32 %v348_v12, %v317_v9  ;;  %v418_v26 = vadd.f32 %v417_v22, %v387_v17  ;;  %v405_v22 = vmul.f32 %v332_v6, %v332_v6 }
  0x5e   : > { %v350_v19 = vadd.f32 %v349_v15, %v318_v13  ;;  %v419_v30 = vadd.f32 %v418_v26, %v388_v21 }
  0x60   : > { %v351_v23 = vadd.f32 %v350_v19, %v319_v16  ;;  %v420_v34 = vadd.f32 %v419_v30, %v389_v25  ;;  %v403_v16 = vmul.f32 %v330_v60, %v330_v60  ;;  %v404_v19 = vmul.f32 %v331_v2, %v331_v2  ;;  %v334_v30 = vld [vmem:[#allocation2] sm:$0x1] }
  0x61   : > { %v406_v25 = vmul.f32 %v333_v10, %v333_v10 }
  0x62   : > { %v352_v27 = vadd.f32 %v351_v23, %v320_v20  ;;  %v421_v38 = vadd.f32 %v420_v34, %v390_v29 }
  0x64   : > { %v353_v31 = vadd.f32 %v352_v27, %v321_v24  ;;  %v422_v42 = vadd.f32 %v421_v38, %v391_v33 }
  0x66   : > { %v354_v35 = vadd.f32 %v353_v31, %v322_v28  ;;  %v423_v46 = vadd.f32 %v422_v42, %v392_v37 }
  0x68   : > { %v355_v39 = vadd.f32 %v354_v35, %v323_v32  ;;  %v424_v50 = vadd.f32 %v423_v46, %v393_v41 }
  0x6a   : > { %v356_v43 = vadd.f32 %v355_v39, %v324_v36  ;;  %v425_v54 = vadd.f32 %v424_v50, %v394_v45  ;;  %v374_v39 = vld [vmem:[#allocation3] sm:$0x1] }
  0x6c   : > { %v357_v47 = vadd.f32 %v356_v43, %v325_v40  ;;  %v426_v58 = vadd.f32 %v425_v54, %v395_v49 }
  0x6e   : > { %v358_v51 = vadd.f32 %v357_v47, %v326_v44  ;;  %v427_v62 = vadd.f32 %v426_v58, %v396_v53  ;;  %v612_v44 = vld [vmem:[%s1684_s2] sm:$0xff] }
  0x70   : > { %v359_v55 = vadd.f32 %v358_v51, %v327_v48  ;;  %v428_v4 = vadd.f32 %v427_v62, %v397_v57  ;;  %v761_v57 = vld [vmem:[%s1685_s3] sm:$0x1] }
  0x72   : > { %v360_v59 = vadd.f32 %v359_v55, %v328_v52  ;;  %v429_v8 = vadd.f32 %v428_v4, %v398_v61 }
  0x74   : > { %v361_v63 = vadd.f32 %v360_v59, %v329_v56  ;;  %v430_v12 = vadd.f32 %v429_v8, %v399_v3 }
  0x76   : > { %v362_v5 = vadd.f32 %v361_v63, %v330_v60  ;;  %v431_v14 = vadd.f32 %v430_v12, %v400_v7  ;;  %v764_v60 = vld [vmem:[%s1686_s4] sm:$0x1] }
  0x78   : > { %v363_v9 = vadd.f32 %v362_v5, %v331_v2  ;;  %v432_v17 = vadd.f32 %v431_v14, %v401_v11 }
  0x7a   : > { %v364_v13 = vadd.f32 %v363_v9, %v332_v6  ;;  %v433_v20 = vadd.f32 %v432_v17, %v402_v0 }
  0x7c   : > { %v365_v15 = vadd.f32 %v364_v13, %v333_v10  ;;  %v434_v23 = vadd.f32 %v433_v20, %v403_v16 }
  0x7e   : > { %v366_v18 = vrot.slane %v365_v15, 4  ;;  %v435_v26 = vadd.f32 %v434_v23, %v404_v19 }
  0x80   : > { %v367_v21 = vadd.f32 %v366_v18, %v365_v15  ;;  %v436_v28 = vadd.f32 %v435_v26, %v405_v22 }
  0x82   : > { %v368_v24 = vrot.slane %v367_v21, 2  ;;  %v437_v31 = vadd.f32 %v436_v28, %v406_v25 }
  0x84   : > { %v369_v27 = vadd.f32 %v368_v24, %v367_v21  ;;  %v438_v33 = vrot.slane %v437_v31, 4 }
  0x86   : > { %v370_v29 = vrot.slane %v369_v27, 1  ;;  %v439_v35 = vadd.f32 %v438_v33, %v437_v31 }
  0x88   : > { %v371_v32 = vadd.f32 %v370_v29, %v369_v27  ;;  %v440_v36 = vrot.slane %v439_v35, 2 }
  0x8a   : > { %v372_v34 = vadd.f32 %v371_v32, %v334_v30  ;;  %v441_v37 = vadd.f32 %v440_v36, %v439_v35 }
  0x8c   : > { %373 = vst [vmem:[#allocation2] sm:$0x1] %v372_v34  ;;  %v442_v38 = vrot.slane %v441_v37, 1 }
  0x8e   : > { %v443_v41 = vadd.f32 %v442_v38, %v441_v37 }
  0x90   : > { %v444_v42 = vadd.f32 %v443_v41, %v374_v39 }
  0x92   : > { %445 = vst [vmem:[#allocation3] sm:$0x1] %v444_v42 }
  0x93   : > { %v449_v40 = vld [vmem:[#allocation2] sm:$0x1] }
  0x94   : > { %990 = vmatmul.mubr.f32.vlgmr.msra.gmra.mrb[0].mxu0 %v449_v40 }
  0x95   : > { %1029 = vmatprep.mubr.msk.f32.mxu0 %vm1310_vm0, %v1309_v1  ;;  %1028 = vmatpush3.msra.mxu0 %v612_v44 }
  0x99   : > { %v536_v43 = vld [vmem:[#allocation3] sm:$0x1] }
  0x9a   : > { %1025 = vmatmul.mubr.f32.vlgmr.msra.gmra.mrb[0].mxu1 %v536_v43 }
  0x9b   : > { %1034 = vmatprep.mubr.msk.f32.mxu1 %vm1310_vm0, %v1309_v1  ;;  %1033 = vmatpush3.msra.mxu1 %v612_v44 }
 0x167   : > { %v532_v45 = vpop.f32.mrb[0].mxu0 }
 0x168   : > { %v608_v46 = vmul.f32 0.0009765625, %v532_v45  ;;  %v991_v47 = vpop.f32.mrb[1].mxu0 }
 0x16a   : > { %1030 = vmatmul.mubr.msk.f32.vlgmr.msra.gmra.mrb[2].mxu0 %vm613_vm1, %v608_v46  ;;  %v610_v48 = vmul.f32 %v608_v46, %v608_v46 }
 0x16d   : > { %v603_v49 = vpop.f32.mrb[0].mxu1 }
 0x16e   : > { %v609_v50 = vmul.f32 0.0009765625, %v603_v49  ;;  %v1026_v51 = vpop.f32.mrb[1].mxu1 }
 0x170   : > { %v611_v52 = vsub.f32 %v609_v50, %v610_v48 }
 0x172   : > { %1035 = vmatmul.mubr.msk.f32.vlgmr.msra.gmra.mrb[2].mxu1 %vm613_vm1, %v611_v52 }
 0x23d   : > { %v683_v1 = vpop.f32.mrb[2].mxu0 }
 0x23e   : > { %v1031_v53 = vpop.f32.mrb[3].mxu0 }
 0x245   : > { %v756_v54 = vpop.f32.mrb[2].mxu1 }
 0x246   : > { %v757_v55 = vadd.f32 1e-05, %v756_v54  ;;  %v1036_v56 = vpop.f32.mrb[3].mxu1 }
 0x248   : > { %1157 = vrsqrt.f32 %v757_v55 }
 0x252   : > { %v1158_v58 = vpop.eup %1157 }
 0x253   : > { %v762_v59 = vmul.f32 %v1158_v58, %v761_v57 }
 0x255   : > { %763 = vst [vmem:[%s288_s9] sm:$0x1] %v762_v59  ;;  %v765_v61 = vmul.f32 %v762_v59, %v683_v1 }
 0x256   : > { %1202 = shalt.err (!%p1199_p5)
}
 0x257   : > { %s1203_s9 = scalar_lea.hbm %s1591_s28, 16  ;;  %s1207_s15 = scalar_lea.hbm %s1687_s5, 32 }
 0x258   : > { %p1204_p4 = scmp.ne.s32.totalorder %s1591_s28, %s1203_s9  ;;  %p1208_p12 = scmp.lt.u32.totalorder %s1591_s28, %s1687_s5 }
 0x259   : > { %p1209_p1 = scmp.lt.u32.totalorder %s1207_s15, %s1203_s9  ;;  %p1211_p8 = scmp.lt.u32.totalorder %s1203_s9, %s1591_s28 }
 0x25a   : > { %p1205_p7 = pnand %p1204_p4, %p1697_p9 }
 0x25b   : > { %p1210_p3 = por %p1209_p1, %p1208_p12 }
 0x25c   : > { %p1206_p10 = pneg %p1205_p7 }
 0x25d   : > { %p1212_p11 = por %p1211_p8, %p1210_p3 }
 0x25f   : > { %p1213_p0 = pnand %p1212_p11, %p1206_p10 }
 0x261   : > { %1216 = shalt.err (!%p1213_p0)
}
 0x262   : > { %1087 = dma.vmem_to_hbm [thread:$0]  (%p1697_p9), %s1593_s18, 16, %s1591_s28, %s769_s30   ;;  %v766_v62 = vsub.f32 %v764_v60, %v765_v61 }
 0x263   : > { %s1630_s27 = scalar_lea.hbm %s1688_s6, %s914_s16  ;;  %s1698_s9 = scalar_lea.vmem [#allocation8], %s1460_s7 }
 0x264   : > { %767 = vst [vmem:[%s1698_s9] sm:$0x1] %v766_v62  ;;  %s773_s17 = scalar_lea.sflag [#allocation9], %s1460_s7  ;;  %s1217_s19 = scalar_lea.vmem %s1633_s13, 16 }
 0x265   : > { %p1218_p6 = scmp.ne.s32.totalorder %s1633_s13, %s1217_s19  ;;  %s1312_s18 = smov [#allocation8]  }
 0x266   : > { %s1221_s24 = sshll.u32 %s1312_s18, 4  ;;  %s1222_s24 = int_to_ptr.vmem [resolvable:$false] %s1221_s24 }
 0x267   : > { %p1219_p13 = pnand %p1218_p6, %p1697_p9  ;;  %s1223_s28 = scalar_lea.vmem %s1222_s24, 32 }
 0x268   : > { %p1224_p5 = scmp.lt.s32.totalorder %s1633_s13, %s1222_s24  ;;  %p1225_p4 = scmp.lt.s32.totalorder %s1223_s28, %s1217_s19 }
 0x269   : > { %p1220_p2 = pneg %p1219_p13 }
 0x26a   : > { %p1226_p7 = por %p1225_p4, %p1224_p5 }
 0x26c   : > { %p1227_p10 = pnand %p1226_p7, %p1220_p2 }
 0x26e   : > { %1230 = shalt.err (!%p1227_p10)
}
 0x26f   : > { %s1231_s7 = scalar_lea.hbm %s1630_s27, 16  ;;  %s1235_s15 = scalar_lea.hbm %s1688_s6, 32 }
 0x270   : > { %p1232_p12 = scmp.ne.s32.totalorder %s1630_s27, %s1231_s7  ;;  %p1236_p8 = scmp.lt.u32.totalorder %s1630_s27, %s1688_s6 }
 0x271   : > { %p1237_p11 = scmp.lt.u32.totalorder %s1235_s15, %s1231_s7  ;;  %p1239_p6 = scmp.lt.u32.totalorder %s1231_s7, %s1630_s27 }
 0x272   : > { %p1233_p1 = pnand %p1232_p12, %p1697_p9 }
 0x273   : > { %p1238_p0 = por %p1237_p11, %p1236_p8 }
 0x274   : > { %p1234_p3 = pneg %p1233_p1 }
 0x275   : > { %p1240_p13 = por %p1239_p6, %p1238_p0 }
 0x277   : > { %p1241_p2 = pnand %p1240_p13, %p1234_p3 }
 0x279   : > { %1244 = shalt.err (!%p1241_p2)
}
 0x27a   : > { %1088 = dma.vmem_to_hbm [thread:$0]  (%p1697_p9), %s1633_s13, 16, %s1630_s27, %s773_s17  }
 0x27b PF: > { %s810_s14 = sand.u32 1, %s1283_s21   ;;  %p1699_p5 = scmp.ne.s32.totalorder %s1694_s12, 0 }
 0x27c   : > { %p1700_p4 = scmp.ge.s32.totalorder %s1303_s26, 2  ;;  %s811_s9 = scalar_lea.sflag [#allocation6], %s810_s14 }
 0x27e   : > { %p1096_p7 = pnand %p1700_p4, %p1699_p5 }
 0x280   : > { %1274 = dma.done.wait (!%p1096_p7), %s811_s9, 16  }
 0x281   : > { %1276 = vsyncadd (!%p1096_p7), %s811_s9, 4294967280  ;;  %s819_s19 = scalar_lea.sflag [#allocation9], %s810_s14 }
 0x282   : > { %1278 = dma.done.wait (!%p1096_p7), %s819_s19, 16  }
 0x283   : > { %1280 = vsyncadd (!%p1096_p7), %s819_s19, 4294967280  ;;  %s26_s26 = sadd.s32 1, %s1303_s26   ;;  %s1701_s21 = smov %s1287_s22 }
 0x284   : > { %p23_p10 = scmp.ge.s32.totalorder %s26_s26, 4   ;;  %s1702_s22 = smov %s1291_s23 }
 0x285   : > { %s1703_s23 = smov %s1404_s11  ;;  %s1704_s24 = smov %s1299_s25 }
 0x286   : > { %s1705_s25 = smov %s1707_s29  ;;  %25 = sbr.rel (!%p23_p10) target bundleno = 8 (0x8), region = 110 }
 0x28d   :  { %823 = vsyncpa [#allocation5], 1 }
 0x28e   :  { %825 = vsyncpa [#allocation5 + $0x1], 1 }
 0x28f   :  { %826 = vsyncpa [#allocation6], 1 }
 0x290   :  { %828 = vsyncpa [#allocation6 + $0x1], 1 }
 0x291   :  { %829 = vsyncpa [#allocation9], 1 }
 0x292   :  { %831 = vsyncpa [#allocation9 + $0x1], 1 }

</bundles_post_ra>
